<compile_context>
chip_gen: v7x
topology: tpu7x:2x2x1
jax: 0.10.0
libtpu: 0.0.40
codegen_flags: <defaults>
</compile_context>

<pallas_src>
import functools

import jax
import jax.numpy as jnp
from jax import lax
from jax.experimental import pallas as pl
from jax.experimental.pallas import tpu as pltpu


def _round_up(a, m):
    return ((a + m - 1) // m) * m


# ------------------------------ fused LSTM kernel ---------------------------
def _lstm_kernel(x_ref, wih_ref, whh_ref, b_ref, h_out_ref, gx_ref, *, unroll):
    T, b_tile, IN = x_ref.shape
    H4 = wih_ref.shape[1]
    H = H4 // 4

    # ---- phase 1: hoisted input projection (off the serial chain) ----------
    # (T*b_tile, IN) bf16 @ (IN, 4H) bf16 -> f32, bias folded in once.
    x_all = x_ref[...].reshape(T * b_tile, IN)            # free reshape (b_tile % 16 == 0)
    wih = wih_ref[...]                                     # (IN, 4H) bf16, grid-invariant
    gx = jnp.dot(x_all, wih, preferred_element_type=jnp.float32)
    gx_ref[...] = (gx + b_ref[...]).reshape(T, b_tile, H4)

    whh = whh_ref[...]                                     # (H, 4H) bf16, resident

    h0 = jnp.zeros((b_tile, H), jnp.float32)
    c0 = jnp.zeros((b_tile, H), jnp.float32)

    # ---- phase 2: recurrence: only h @ W_hh^T + nonlinearities per step -----
    def step(t, carry):
        h, c = carry
        gates = gx_ref[t] + jnp.dot(h.astype(jnp.bfloat16), whh,
                                    preferred_element_type=jnp.float32)   # (b_tile, 4H)
        sg = jax.nn.sigmoid(gates)          # one full-lane EUP pass for i, f, o
        tg = jnp.tanh(gates)                # one full-lane EUP pass for g
        i = sg[:, 0 * H:1 * H]
        f = sg[:, 1 * H:2 * H]
        o = sg[:, 3 * H:4 * H]
        g = tg[:, 2 * H:3 * H]
        c_new = f * c + i * g
        h_new = o * jnp.tanh(c_new)
        return (h_new, c_new)

    h_final, _ = lax.fori_loop(0, T, step, (h0, c0), unroll=unroll)
    h_out_ref[...] = h_final.astype(h_out_ref.dtype)


# ------------------------------ wrapper --------------------------------------
def lstm_embedder(x, w_ih, w_hh, b_ih, b_hh):
    """x: (B, T, N, C).  PyTorch-layout single-layer LSTM params:
       w_ih (4H, N*C), w_hh (4H, H), b_ih (4H,), b_hh (4H,).  Returns h_T (B, H)."""
    B, T, N, C = x.shape
    IN = N * C
    H4 = w_ih.shape[0]
    H = H4 // 4

    # --- batch tiling --------------------------------------------------------
    # per-batch-row VMEM bytes: double-buffered bf16 x block + f32 gate scratch
    per_row_bytes = 2 * T * IN * 2 + T * H4 * 4 + 4 * H * 4
    vmem_budget = 10 * 1024 * 1024            # conservative: fits v5e 16 MiB scoped default
    cap = max(16, (vmem_budget // per_row_bytes) // 16 * 16)
    want = B if B <= 32 else -(-B // 2)       # >=2 grid steps -> both v7x TensorCores busy
    b_tile = max(16, min(128, cap, _round_up(want, 16)))
    B_pad = _round_up(B, b_tile)

    # --- operand prep ---------------------------------------------------------
    # One small XLA prep pass: time-major + bf16 downcast fused together.
    x_tm = jnp.transpose(x.reshape(B, T, IN), (1, 0, 2)).astype(jnp.bfloat16)
    if B_pad != B:
        x_tm = jnp.pad(x_tm, ((0, 0), (0, B_pad - B), (0, 0)))

    wih_t = jnp.asarray(w_ih).astype(jnp.bfloat16).T           # (IN, 4H)
    whh_t = jnp.asarray(w_hh).astype(jnp.bfloat16).T           # (H, 4H)
    bias = (jnp.asarray(b_ih, jnp.float32)
            + jnp.asarray(b_hh, jnp.float32)).reshape(1, H4)   # fused PyTorch biases

    unroll = int(min(max(T, 1), 8))
    kernel = functools.partial(_lstm_kernel, unroll=unroll)

    out = pl.pallas_call(
        kernel,
        out_shape=jax.ShapeDtypeStruct((B_pad, H), jnp.float32),
        grid=(B_pad // b_tile,),
        in_specs=[
            pl.BlockSpec((T, b_tile, IN), lambda i: (0, i, 0)),   # x, per batch tile (bf16)
            pl.BlockSpec((IN, H4), lambda i: (0, 0)),             # W_ih^T, resident
            pl.BlockSpec((H, H4), lambda i: (0, 0)),              # W_hh^T, resident
            pl.BlockSpec((1, H4), lambda i: (0, 0)),              # fused bias (f32)
        ],
        out_specs=pl.BlockSpec((b_tile, H), lambda i: (i, 0)),
        scratch_shapes=[pltpu.VMEM((T, b_tile, H4), jnp.float32)],  # hoisted gate block
        compiler_params=pltpu.CompilerParams(
            dimension_semantics=("parallel",)),                   # megacore over batch tiles
    )(x_tm, wih_t, whh_t, bias)
    return out[:B]


# ------------------------------ pure-JAX reference ---------------------------
def _reference(x, w_ih, w_hh, b_ih, b_hh):
    B, T, N, C = x.shape
    xin = x.reshape(B, T, N * C)
    H = w_hh.shape[1]
    h0 = jnp.zeros((B, H), jnp.float32)
    c0 = jnp.zeros((B, H), jnp.float32)

    def cell(carry, xt):
        h, c = carry
        gates = xt @ w_ih.T + b_ih + h @ w_hh.T + b_hh
        i, f, g, o = jnp.split(gates, 4, axis=-1)
        c = jax.nn.sigmoid(f) * c + jax.nn.sigmoid(i) * jnp.tanh(g)
        h = jax.nn.sigmoid(o) * jnp.tanh(c)
        return (h, c), None

    (h, _), _ = lax.scan(cell, (h0, c0), jnp.swapaxes(xin, 0, 1))
    return h


if __name__ == "__main__":
    # LSTMEmbedder(input_dim=N*C=64, hidden_dim=32, num_layers=1)
    B, T, N, C = 2, 8, 16, 4
    H = 32
    key = jax.random.PRNGKey(0)
    kx, k1, k2, k3, k4 = jax.random.split(key, 5)
    bound = 1.0 / (H ** 0.5)    # PyTorch LSTM default init scale
    x = jax.random.normal(kx, (B, T, N, C), dtype=jnp.float32)
    w_ih = jax.random.uniform(k1, (4 * H, N * C), jnp.float32, -bound, bound)
    w_hh = jax.random.uniform(k2, (4 * H, H), jnp.float32, -bound, bound)
    b_ih = jax.random.uniform(k3, (4 * H,), jnp.float32, -bound, bound)
    b_hh = jax.random.uniform(k4, (4 * H,), jnp.float32, -bound, bound)

    out = jax.jit(lstm_embedder)(x, w_ih, w_hh, b_ih, b_hh)
    out = jax.block_until_ready(out)

    ref = _reference(x, w_ih, w_hh, b_ih, b_hh)
    assert out.shape == (B, H), out.shape
    max_err = float(jnp.max(jnp.abs(out - ref)))
    # bf16 MXU operands with f32 accumulation -> relaxed tolerance vs f32 reference
    assert max_err < 3e-2, f"max abs error {max_err}"
    print("KERNEL_OK")
</pallas_src>

<mosaic_0001>
module attributes {stable_mosaic.version = 11 : i64} {
  func.func @_lstm_kernel(%arg0: i32, %arg1: memref<8x16x64xbf16, #tpu.memory_space<vmem>>, %arg2: memref<64x128xbf16, #tpu.memory_space<vmem>>, %arg3: memref<32x128xbf16, #tpu.memory_space<vmem>>, %arg4: memref<1x128xf32, #tpu.memory_space<vmem>>, %arg5: memref<16x32xf32, #tpu.memory_space<vmem>>, %arg6: memref<8x16x128xf32, #tpu.memory_space<vmem>>) attributes {dimension_semantics = [#tpu.dimension_semantics<parallel>], iteration_bounds = array<i64: 1>, scalar_prefetch = 0 : i64, scratch_operands = 1 : i64, tpu.core_type = #tpu.core_type<tc>, window_params = [{transform_indices = @transform_0, window_bounds = array<i64: 8, 16, 64>}, {pipeline_mode = #tpu.pipeline_mode<synchronous>, transform_indices = @transform_1, window_bounds = array<i64: 64, 128>}, {pipeline_mode = #tpu.pipeline_mode<synchronous>, transform_indices = @transform_2, window_bounds = array<i64: 32, 128>}, {pipeline_mode = #tpu.pipeline_mode<synchronous>, transform_indices = @transform_3, window_bounds = array<i64: 1, 128>}, {transform_indices = @transform_4, window_bounds = array<i64: 16, 32>}]} {
    %c0 = arith.constant 0 : index
    %c0_0 = arith.constant 0 : index
    %c0_1 = arith.constant 0 : index
    %0 = vector.load %arg1[%c0, %c0_0, %c0_1] : memref<8x16x64xbf16, #tpu.memory_space<vmem>>, vector<8x16x64xbf16>
    %1 = vector.shape_cast %0 : vector<8x16x64xbf16> to vector<128x64xbf16>
    %c0_2 = arith.constant 0 : index
    %c0_3 = arith.constant 0 : index
    %2 = vector.load %arg2[%c0_2, %c0_3] : memref<64x128xbf16, #tpu.memory_space<vmem>>, vector<64x128xbf16>
    %cst = arith.constant dense<0.000000e+00> : vector<128x128xf32>
    %3 = tpu.matmul %1, %2, %cst {dimension_numbers = #tpu.dot_dimension_numbers<[1], [0], [0], [1], [0, 0, 1, 1], [], []>} : vector<128x64xbf16>, vector<64x128xbf16>, vector<128x128xf32> -> vector<128x128xf32>
    %c0_4 = arith.constant 0 : index
    %c0_5 = arith.constant 0 : index
    %4 = vector.load %arg4[%c0_4, %c0_5] : memref<1x128xf32, #tpu.memory_space<vmem>>, vector<1x128xf32>
    %5 = vector.broadcast %4 : vector<1x128xf32> to vector<128x128xf32>
    %6 = arith.addf %3, %5 : vector<128x128xf32>
    %7 = vector.shape_cast %6 : vector<128x128xf32> to vector<8x16x128xf32>
    %c0_6 = arith.constant 0 : index
    %c0_7 = arith.constant 0 : index
    %c0_8 = arith.constant 0 : index
    %8 = vector.load %arg6[%c0_6, %c0_7, %c0_8] : memref<8x16x128xf32, #tpu.memory_space<vmem>>, vector<8x16x128xf32>
    tpu.vector_store %arg6[%c0_6, %c0_7, %c0_8], %7 {strides = array<i32>} : memref<8x16x128xf32, #tpu.memory_space<vmem>>, vector<8x16x128xf32>,
    %c0_9 = arith.constant 0 : index
    %c0_10 = arith.constant 0 : index
    %9 = vector.load %arg3[%c0_9, %c0_10] : memref<32x128xbf16, #tpu.memory_space<vmem>>, vector<32x128xbf16>
    %cst_11 = arith.constant 0.000000e+00 : f32
    %10 = vector.broadcast %cst_11 : f32 to vector<16x32xf32>
    %cst_12 = arith.constant 0.000000e+00 : f32
    %11 = vector.broadcast %cst_12 : f32 to vector<16x32xf32>
    %c0_i32 = arith.constant 0 : i32
    %12 = arith.index_cast %c0_i32 : i32 to index
    %c0_13 = arith.constant 0 : index
    %c0_14 = arith.constant 0 : index
    %13 = vector.load %arg6[%12, %c0_13, %c0_14] : memref<8x16x128xf32, #tpu.memory_space<vmem>>, vector<1x16x128xf32>
    %14 = vector.shape_cast %13 : vector<1x16x128xf32> to vector<16x128xf32>
    %15 = arith.truncf %10 : vector<16x32xf32> to vector<16x32xbf16>
    %cst_15 = arith.constant dense<0.000000e+00> : vector<16x128xf32>
    %16 = tpu.matmul %15, %9, %cst_15 {dimension_numbers = #tpu.dot_dimension_numbers<[1], [0], [0], [1], [0, 0, 1, 1], [], []>} : vector<16x32xbf16>, vector<32x128xbf16>, vector<16x128xf32> -> vector<16x128xf32>
    %17 = arith.addf %14, %16 : vector<16x128xf32>
    %18 = arith.negf %17 : vector<16x128xf32>
    %19 = math.exp %18 : vector<16x128xf32>
    %cst_16 = arith.constant 1.000000e+00 : f32
    %20 = vector.broadcast %cst_16 : f32 to vector<16x128xf32>
    %21 = arith.addf %20, %19 : vector<16x128xf32>
    %22 = arith.divf %20, %21 : vector<16x128xf32>
    %23 = math.tanh %17 : vector<16x128xf32>
    %24 = vector.extract_strided_slice %22 {offsets = [0, 0], sizes = [16, 32], strides = [1, 1]} : vector<16x128xf32> to vector<16x32xf32>
    %25 = vector.extract_strided_slice %22 {offsets = [0, 32], sizes = [16, 32], strides = [1, 1]} : vector<16x128xf32> to vector<16x32xf32>
    %26 = vector.extract_strided_slice %22 {offsets = [0, 96], sizes = [16, 32], strides = [1, 1]} : vector<16x128xf32> to vector<16x32xf32>
    %27 = vector.extract_strided_slice %23 {offsets = [0, 64], sizes = [16, 32], strides = [1, 1]} : vector<16x128xf32> to vector<16x32xf32>
    %28 = arith.mulf %25, %11 : vector<16x32xf32>
    %29 = arith.mulf %24, %27 : vector<16x32xf32>
    %30 = arith.addf %28, %29 : vector<16x32xf32>
    %31 = math.tanh %30 : vector<16x32xf32>
    %32 = arith.mulf %26, %31 : vector<16x32xf32>
    %c1_i32 = arith.constant 1 : i32
    %33 = arith.index_cast %c1_i32 : i32 to index
    %c0_17 = arith.constant 0 : index
    %c0_18 = arith.constant 0 : index
    %34 = vector.load %arg6[%33, %c0_17, %c0_18] : memref<8x16x128xf32, #tpu.memory_space<vmem>>, vector<1x16x128xf32>
    %35 = vector.shape_cast %34 : vector<1x16x128xf32> to vector<16x128xf32>
    %36 = arith.truncf %32 : vector<16x32xf32> to vector<16x32xbf16>
    %cst_19 = arith.constant dense<0.000000e+00> : vector<16x128xf32>
    %37 = tpu.matmul %36, %9, %cst_19 {dimension_numbers = #tpu.dot_dimension_numbers<[1], [0], [0], [1], [0, 0, 1, 1], [], []>} : vector<16x32xbf16>, vector<32x128xbf16>, vector<16x128xf32> -> vector<16x128xf32>
    %38 = arith.addf %35, %37 : vector<16x128xf32>
    %39 = arith.negf %38 : vector<16x128xf32>
    %40 = math.exp %39 : vector<16x128xf32>
    %cst_20 = arith.constant 1.000000e+00 : f32
    %41 = vector.broadcast %cst_20 : f32 to vector<16x128xf32>
    %42 = arith.addf %41, %40 : vector<16x128xf32>
    %43 = arith.divf %41, %42 : vector<16x128xf32>
    %44 = math.tanh %38 : vector<16x128xf32>
    %45 = vector.extract_strided_slice %43 {offsets = [0, 0], sizes = [16, 32], strides = [1, 1]} : vector<16x128xf32> to vector<16x32xf32>
    %46 = vector.extract_strided_slice %43 {offsets = [0, 32], sizes = [16, 32], strides = [1, 1]} : vector<16x128xf32> to vector<16x32xf32>
    %47 = vector.extract_strided_slice %43 {offsets = [0, 96], sizes = [16, 32], strides = [1, 1]} : vector<16x128xf32> to vector<16x32xf32>
    %48 = vector.extract_strided_slice %44 {offsets = [0, 64], sizes = [16, 32], strides = [1, 1]} : vector<16x128xf32> to vector<16x32xf32>
    %49 = arith.mulf %46, %30 : vector<16x32xf32>
    %50 = arith.mulf %45, %48 : vector<16x32xf32>
    %51 = arith.addf %49, %50 : vector<16x32xf32>
    %52 = math.tanh %51 : vector<16x32xf32>
    %53 = arith.mulf %47, %52 : vector<16x32xf32>
    %c2_i32 = arith.constant 2 : i32
    %54 = arith.index_cast %c2_i32 : i32 to index
    %c0_21 = arith.constant 0 : index
    %c0_22 = arith.constant 0 : index
    %55 = vector.load %arg6[%54, %c0_21, %c0_22] : memref<8x16x128xf32, #tpu.memory_space<vmem>>, vector<1x16x128xf32>
    %56 = vector.shape_cast %55 : vector<1x16x128xf32> to vector<16x128xf32>
    %57 = arith.truncf %53 : vector<16x32xf32> to vector<16x32xbf16>
    %cst_23 = arith.constant dense<0.000000e+00> : vector<16x128xf32>
    %58 = tpu.matmul %57, %9, %cst_23 {dimension_numbers = #tpu.dot_dimension_numbers<[1], [0], [0], [1], [0, 0, 1, 1], [], []>} : vector<16x32xbf16>, vector<32x128xbf16>, vector<16x128xf32> -> vector<16x128xf32>
    %59 = arith.addf %56, %58 : vector<16x128xf32>
    %60 = arith.negf %59 : vector<16x128xf32>
    %61 = math.exp %60 : vector<16x128xf32>
    %cst_24 = arith.constant 1.000000e+00 : f32
    %62 = vector.broadcast %cst_24 : f32 to vector<16x128xf32>
    %63 = arith.addf %62, %61 : vector<16x128xf32>
    %64 = arith.divf %62, %63 : vector<16x128xf32>
    %65 = math.tanh %59 : vector<16x128xf32>
    %66 = vector.extract_strided_slice %64 {offsets = [0, 0], sizes = [16, 32], strides = [1, 1]} : vector<16x128xf32> to vector<16x32xf32>
    %67 = vector.extract_strided_slice %64 {offsets = [0, 32], sizes = [16, 32], strides = [1, 1]} : vector<16x128xf32> to vector<16x32xf32>
    %68 = vector.extract_strided_slice %64 {offsets = [0, 96], sizes = [16, 32], strides = [1, 1]} : vector<16x128xf32> to vector<16x32xf32>
    %69 = vector.extract_strided_slice %65 {offsets = [0, 64], sizes = [16, 32], strides = [1, 1]} : vector<16x128xf32> to vector<16x32xf32>
    %70 = arith.mulf %67, %51 : vector<16x32xf32>
    %71 = arith.mulf %66, %69 : vector<16x32xf32>
    %72 = arith.addf %70, %71 : vector<16x32xf32>
    %73 = math.tanh %72 : vector<16x32xf32>
    %74 = arith.mulf %68, %73 : vector<16x32xf32>
    %c3_i32 = arith.constant 3 : i32
    %75 = arith.index_cast %c3_i32 : i32 to index
    %c0_25 = arith.constant 0 : index
    %c0_26 = arith.constant 0 : index
    %76 = vector.load %arg6[%75, %c0_25, %c0_26] : memref<8x16x128xf32, #tpu.memory_space<vmem>>, vector<1x16x128xf32>
    %77 = vector.shape_cast %76 : vector<1x16x128xf32> to vector<16x128xf32>
    %78 = arith.truncf %74 : vector<16x32xf32> to vector<16x32xbf16>
    %cst_27 = arith.constant dense<0.000000e+00> : vector<16x128xf32>
    %79 = tpu.matmul %78, %9, %cst_27 {dimension_numbers = #tpu.dot_dimension_numbers<[1], [0], [0], [1], [0, 0, 1, 1], [], []>} : vector<16x32xbf16>, vector<32x128xbf16>, vector<16x128xf32> -> vector<16x128xf32>
    %80 = arith.addf %77, %79 : vector<16x128xf32>
    %81 = arith.negf %80 : vector<16x128xf32>
    %82 = math.exp %81 : vector<16x128xf32>
    %cst_28 = arith.constant 1.000000e+00 : f32
    %83 = vector.broadcast %cst_28 : f32 to vector<16x128xf32>
    %84 = arith.addf %83, %82 : vector<16x128xf32>
    %85 = arith.divf %83, %84 : vector<16x128xf32>
    %86 = math.tanh %80 : vector<16x128xf32>
    %87 = vector.extract_strided_slice %85 {offsets = [0, 0], sizes = [16, 32], strides = [1, 1]} : vector<16x128xf32> to vector<16x32xf32>
    %88 = vector.extract_strided_slice %85 {offsets = [0, 32], sizes = [16, 32], strides = [1, 1]} : vector<16x128xf32> to vector<16x32xf32>
    %89 = vector.extract_strided_slice %85 {offsets = [0, 96], sizes = [16, 32], strides = [1, 1]} : vector<16x128xf32> to vector<16x32xf32>
    %90 = vector.extract_strided_slice %86 {offsets = [0, 64], sizes = [16, 32], strides = [1, 1]} : vector<16x128xf32> to vector<16x32xf32>
    %91 = arith.mulf %88, %72 : vector<16x32xf32>
    %92 = arith.mulf %87, %90 : vector<16x32xf32>
    %93 = arith.addf %91, %92 : vector<16x32xf32>
    %94 = math.tanh %93 : vector<16x32xf32>
    %95 = arith.mulf %89, %94 : vector<16x32xf32>
    %c4_i32 = arith.constant 4 : i32
    %96 = arith.index_cast %c4_i32 : i32 to index
    %c0_29 = arith.constant 0 : index
    %c0_30 = arith.constant 0 : index
    %97 = vector.load %arg6[%96, %c0_29, %c0_30] : memref<8x16x128xf32, #tpu.memory_space<vmem>>, vector<1x16x128xf32>
    %98 = vector.shape_cast %97 : vector<1x16x128xf32> to vector<16x128xf32>
    %99 = arith.truncf %95 : vector<16x32xf32> to vector<16x32xbf16>
    %cst_31 = arith.constant dense<0.000000e+00> : vector<16x128xf32>
    %100 = tpu.matmul %99, %9, %cst_31 {dimension_numbers = #tpu.dot_dimension_numbers<[1], [0], [0], [1], [0, 0, 1, 1], [], []>} : vector<16x32xbf16>, vector<32x128xbf16>, vector<16x128xf32> -> vector<16x128xf32>
    %101 = arith.addf %98, %100 : vector<16x128xf32>
    %102 = arith.negf %101 : vector<16x128xf32>
    %103 = math.exp %102 : vector<16x128xf32>
    %cst_32 = arith.constant 1.000000e+00 : f32
    %104 = vector.broadcast %cst_32 : f32 to vector<16x128xf32>
    %105 = arith.addf %104, %103 : vector<16x128xf32>
    %106 = arith.divf %104, %105 : vector<16x128xf32>
    %107 = math.tanh %101 : vector<16x128xf32>
    %108 = vector.extract_strided_slice %106 {offsets = [0, 0], sizes = [16, 32], strides = [1, 1]} : vector<16x128xf32> to vector<16x32xf32>
    %109 = vector.extract_strided_slice %106 {offsets = [0, 32], sizes = [16, 32], strides = [1, 1]} : vector<16x128xf32> to vector<16x32xf32>
    %110 = vector.extract_strided_slice %106 {offsets = [0, 96], sizes = [16, 32], strides = [1, 1]} : vector<16x128xf32> to vector<16x32xf32>
    %111 = vector.extract_strided_slice %107 {offsets = [0, 64], sizes = [16, 32], strides = [1, 1]} : vector<16x128xf32> to vector<16x32xf32>
    %112 = arith.mulf %109, %93 : vector<16x32xf32>
    %113 = arith.mulf %108, %111 : vector<16x32xf32>
    %114 = arith.addf %112, %113 : vector<16x32xf32>
    %115 = math.tanh %114 : vector<16x32xf32>
    %116 = arith.mulf %110, %115 : vector<16x32xf32>
    %c5_i32 = arith.constant 5 : i32
    %117 = arith.index_cast %c5_i32 : i32 to index
    %c0_33 = arith.constant 0 : index
    %c0_34 = arith.constant 0 : index
    %118 = vector.load %arg6[%117, %c0_33, %c0_34] : memref<8x16x128xf32, #tpu.memory_space<vmem>>, vector<1x16x128xf32>
    %119 = vector.shape_cast %118 : vector<1x16x128xf32> to vector<16x128xf32>
    %120 = arith.truncf %116 : vector<16x32xf32> to vector<16x32xbf16>
    %cst_35 = arith.constant dense<0.000000e+00> : vector<16x128xf32>
    %121 = tpu.matmul %120, %9, %cst_35 {dimension_numbers = #tpu.dot_dimension_numbers<[1], [0], [0], [1], [0, 0, 1, 1], [], []>} : vector<16x32xbf16>, vector<32x128xbf16>, vector<16x128xf32> -> vector<16x128xf32>
    %122 = arith.addf %119, %121 : vector<16x128xf32>
    %123 = arith.negf %122 : vector<16x128xf32>
    %124 = math.exp %123 : vector<16x128xf32>
    %cst_36 = arith.constant 1.000000e+00 : f32
    %125 = vector.broadcast %cst_36 : f32 to vector<16x128xf32>
    %126 = arith.addf %125, %124 : vector<16x128xf32>
    %127 = arith.divf %125, %126 : vector<16x128xf32>
    %128 = math.tanh %122 : vector<16x128xf32>
    %129 = vector.extract_strided_slice %127 {offsets = [0, 0], sizes = [16, 32], strides = [1, 1]} : vector<16x128xf32> to vector<16x32xf32>
    %130 = vector.extract_strided_slice %127 {offsets = [0, 32], sizes = [16, 32], strides = [1, 1]} : vector<16x128xf32> to vector<16x32xf32>
    %131 = vector.extract_strided_slice %127 {offsets = [0, 96], sizes = [16, 32], strides = [1, 1]} : vector<16x128xf32> to vector<16x32xf32>
    %132 = vector.extract_strided_slice %128 {offsets = [0, 64], sizes = [16, 32], strides = [1, 1]} : vector<16x128xf32> to vector<16x32xf32>
    %133 = arith.mulf %130, %114 : vector<16x32xf32>
    %134 = arith.mulf %129, %132 : vector<16x32xf32>
    %135 = arith.addf %133, %134 : vector<16x32xf32>
    %136 = math.tanh %135 : vector<16x32xf32>
    %137 = arith.mulf %131, %136 : vector<16x32xf32>
    %c6_i32 = arith.constant 6 : i32
    %138 = arith.index_cast %c6_i32 : i32 to index
    %c0_37 = arith.constant 0 : index
    %c0_38 = arith.constant 0 : index
    %139 = vector.load %arg6[%138, %c0_37, %c0_38] : memref<8x16x128xf32, #tpu.memory_space<vmem>>, vector<1x16x128xf32>
    %140 = vector.shape_cast %139 : vector<1x16x128xf32> to vector<16x128xf32>
    %141 = arith.truncf %137 : vector<16x32xf32> to vector<16x32xbf16>
    %cst_39 = arith.constant dense<0.000000e+00> : vector<16x128xf32>
    %142 = tpu.matmul %141, %9, %cst_39 {dimension_numbers = #tpu.dot_dimension_numbers<[1], [0], [0], [1], [0, 0, 1, 1], [], []>} : vector<16x32xbf16>, vector<32x128xbf16>, vector<16x128xf32> -> vector<16x128xf32>
    %143 = arith.addf %140, %142 : vector<16x128xf32>
    %144 = arith.negf %143 : vector<16x128xf32>
    %145 = math.exp %144 : vector<16x128xf32>
    %cst_40 = arith.constant 1.000000e+00 : f32
    %146 = vector.broadcast %cst_40 : f32 to vector<16x128xf32>
    %147 = arith.addf %146, %145 : vector<16x128xf32>
    %148 = arith.divf %146, %147 : vector<16x128xf32>
    %149 = math.tanh %143 : vector<16x128xf32>
    %150 = vector.extract_strided_slice %148 {offsets = [0, 0], sizes = [16, 32], strides = [1, 1]} : vector<16x128xf32> to vector<16x32xf32>
    %151 = vector.extract_strided_slice %148 {offsets = [0, 32], sizes = [16, 32], strides = [1, 1]} : vector<16x128xf32> to vector<16x32xf32>
    %152 = vector.extract_strided_slice %148 {offsets = [0, 96], sizes = [16, 32], strides = [1, 1]} : vector<16x128xf32> to vector<16x32xf32>
    %153 = vector.extract_strided_slice %149 {offsets = [0, 64], sizes = [16, 32], strides = [1, 1]} : vector<16x128xf32> to vector<16x32xf32>
    %154 = arith.mulf %151, %135 : vector<16x32xf32>
    %155 = arith.mulf %150, %153 : vector<16x32xf32>
    %156 = arith.addf %154, %155 : vector<16x32xf32>
    %157 = math.tanh %156 : vector<16x32xf32>
    %158 = arith.mulf %152, %157 : vector<16x32xf32>
    %c7_i32 = arith.constant 7 : i32
    %159 = arith.index_cast %c7_i32 : i32 to index
    %c0_41 = arith.constant 0 : index
    %c0_42 = arith.constant 0 : index
    %160 = vector.load %arg6[%159, %c0_41, %c0_42] : memref<8x16x128xf32, #tpu.memory_space<vmem>>, vector<1x16x128xf32>
    %161 = vector.shape_cast %160 : vector<1x16x128xf32> to vector<16x128xf32>
    %162 = arith.truncf %158 : vector<16x32xf32> to vector<16x32xbf16>
    %cst_43 = arith.constant dense<0.000000e+00> : vector<16x128xf32>
    %163 = tpu.matmul %162, %9, %cst_43 {dimension_numbers = #tpu.dot_dimension_numbers<[1], [0], [0], [1], [0, 0, 1, 1], [], []>} : vector<16x32xbf16>, vector<32x128xbf16>, vector<16x128xf32> -> vector<16x128xf32>
    %164 = arith.addf %161, %163 : vector<16x128xf32>
    %165 = arith.negf %164 : vector<16x128xf32>
    %166 = math.exp %165 : vector<16x128xf32>
    %cst_44 = arith.constant 1.000000e+00 : f32
    %167 = vector.broadcast %cst_44 : f32 to vector<16x128xf32>
    %168 = arith.addf %167, %166 : vector<16x128xf32>
    %169 = arith.divf %167, %168 : vector<16x128xf32>
    %170 = math.tanh %164 : vector<16x128xf32>
    %171 = vector.extract_strided_slice %169 {offsets = [0, 0], sizes = [16, 32], strides = [1, 1]} : vector<16x128xf32> to vector<16x32xf32>
    %172 = vector.extract_strided_slice %169 {offsets = [0, 32], sizes = [16, 32], strides = [1, 1]} : vector<16x128xf32> to vector<16x32xf32>
    %173 = vector.extract_strided_slice %169 {offsets = [0, 96], sizes = [16, 32], strides = [1, 1]} : vector<16x128xf32> to vector<16x32xf32>
    %174 = vector.extract_strided_slice %170 {offsets = [0, 64], sizes = [16, 32], strides = [1, 1]} : vector<16x128xf32> to vector<16x32xf32>
    %175 = arith.mulf %172, %156 : vector<16x32xf32>
    %176 = arith.mulf %171, %174 : vector<16x32xf32>
    %177 = arith.addf %175, %176 : vector<16x32xf32>
    %178 = math.tanh %177 : vector<16x32xf32>
    %179 = arith.mulf %173, %178 : vector<16x32xf32>
    %c8_i32 = arith.constant 8 : i32
    %c0_45 = arith.constant 0 : index
    %c0_46 = arith.constant 0 : index
    %180 = vector.load %arg5[%c0_45, %c0_46] : memref<16x32xf32, #tpu.memory_space<vmem>>, vector<16x32xf32>
    tpu.vector_store %arg5[%c0_45, %c0_46], %179 {strides = array<i32>} : memref<16x32xf32, #tpu.memory_space<vmem>>, vector<16x32xf32>,
    return
  }
  func.func @transform_0(%arg0: i32) -> (i32, i32, i32) {
    %c0_i32 = arith.constant 0 : i32
    %c0_i32_0 = arith.constant 0 : i32
    %c0_i32_1 = arith.constant 0 : i32
    return %c0_i32, %arg0, %c0_i32_0 : i32, i32, i32
  }
  func.func @transform_1(%arg0: i32) -> (i32, i32) {
    %c0_i32 = arith.constant 0 : i32
    %c0_i32_0 = arith.constant 0 : i32
    %c0_i32_1 = arith.constant 0 : i32
    return %c0_i32, %c0_i32_0 : i32, i32
  }
  func.func @transform_2(%arg0: i32) -> (i32, i32) {
    %c0_i32 = arith.constant 0 : i32
    %c0_i32_0 = arith.constant 0 : i32
    %c0_i32_1 = arith.constant 0 : i32
    return %c0_i32, %c0_i32_0 : i32, i32
  }
  func.func @transform_3(%arg0: i32) -> (i32, i32) {
    %c0_i32 = arith.constant 0 : i32
    %c0_i32_0 = arith.constant 0 : i32
    %c0_i32_1 = arith.constant 0 : i32
    return %c0_i32, %c0_i32_0 : i32, i32
  }
  func.func @transform_4(%arg0: i32) -> (i32, i32) {
    %c0_i32 = arith.constant 0 : i32
    %c0_i32_0 = arith.constant 0 : i32
    return %arg0, %c0_i32 : i32, i32
  }
}

</mosaic_0001>

<bundles_post_ra>
// kernel: lstm_embedder.1
= control target key start
LH: loop header
LB: loop body
LE: loop exit
PB: predicated region body
PF: predicated region fallthrough
CT: control target
= control target key end

     0   :  { %v1402_v1 = vmov 0.0   ;;  %vm1403_vm0 = vmmov 0   ;;  %vm113_vm1 = vcmask 523264   ;;  %v1404_v8 = vmov 0   ;;  %s1405_s5 = smov 64   ;;  %s1653_s1 = inlined_call_operand.vmem [shape: bf16[64,128], index: 1, kind: input, shape index: {}]   ;;  %s1654_s2 = inlined_call_operand.vmem [shape: bf16[32,128], index: 2, kind: input, shape index: {}]   ;;  %s1655_s0 = inlined_call_operand.vmem [shape: bf16[8,16,64], index: 0, kind: input, shape index: {}]   ;;  %s1656_s3 = inlined_call_operand.vmem [shape: f32[1,128], index: 3, kind: input, shape index: {}]   ;;  %s1657_s4 = inlined_call_operand.vmem [shape: f32[16,32], index: 4, kind: output, shape index: {}]  }
   0x1   :  { %v1260_v0 = vld [vmem:[%s1653_s1] sm:$0xff]   ;;  %1191 = vmatprep.subr.bf16.mxu1 %v1402_v1  ;;  %1195 = vmatprep.mubr.msk.bf16.mxu1 %vm1403_vm0, %v1402_v1  ;;  %v1261_v2 = vld [vmem:[%s1653_s1 + $0x8] sm:$0xff]   ;;  %v1262_v4 = vld [vmem:[%s1653_s1 + $0x10] sm:$0xff]   ;;  %vm269_vm2 = vcmask 261120  }
   0x2   :  { %1167 = vmatprep.subr.bf16.mxu0 %v1260_v0  ;;  %v1444_v3 = vld [vmem:[%s1654_s2] sm:$0xff]   ;;  %v1453_v5 = vld [vmem:[%s1654_s2 + $0x8] sm:$0xff]   ;;  %v1264_v7 = vld [vmem:[%s1653_s1 + $0x18] sm:$0xff]  }
   0x3   :  { %1168 = vmatpush3.bf16.msra.mxu0 %v1260_v0  ;;  %1192 = vmatpush3.bf16.msra.mxu1 %v1444_v3  ;;  %v1266_v6 = vld [vmem:[%s1655_s0] sm:$0xff]   ;;  %v1267_v9 = vld [vmem:[%s1655_s0 + $0x8] sm:$0xff]  }
   0x4   :  { %1169 = vmatprep.subr.bf16.mxu0 %v1261_v2  ;;  %1193 = vmatprep.subr.bf16.mxu1 %v1402_v1  ;;  %v1483_v14 = vld [vmem:[%s1656_s3] ss:$0 sm:$0xff]  ;;  %s1406_s3 = smov 32  }
   0x5   :  { %1175 = vmatprep.mubr.msk.bf16.mxu0 %vm113_vm1, %v1266_v6 }
   0x7   :  { %1170 = vmatpush3.bf16.msra.mxu0 %v1261_v2  ;;  %1194 = vmatpush3.bf16.msra.mxu1 %v1453_v5 }
   0x8   :  { %1171 = vmatprep.subr.bf16.mxu0 %v1262_v4  ;;  %1199 = vmatprep.subr.bf16.mxu1 %v1402_v1 }
   0xa   :  { %1196 = vmatmul.mubr.bf16.vlgmr.msra.gmra.mrb[0].mxu1 %v1404_v8 }
   0xb   :  { %1172 = vmatpush3.bf16.msra.mxu0 %v1262_v4  ;;  %1200 = vmatpush3.bf16.msra.mxu1 %v1444_v3 }
   0xc   :  { %1173 = vmatprep.subr.bf16.mxu0 %v1264_v7  ;;  %1203 = vmatprep.mubr.msk.bf16.mxu1 %vm1403_vm0, %v1402_v1 }
   0xd   :  { %1201 = vmatprep.subr.bf16.mxu1 %v1402_v1 }
   0xf   :  { %1174 = vmatpush3.bf16.msra.mxu0 %v1264_v7  ;;  %1202 = vmatpush3.bf16.msra.mxu1 %v1453_v5 }
  0x10   :  { %1231 = vmatprep.subr.bf16.mxu0 %v1402_v1  ;;  %1207 = vmatprep.subr.bf16.mxu1 %v1402_v1 }
  0x12   :  { %1176 = vmatmul.mubr.msk.bf16.vlgmr.msra.gmra.mrb[0].mxu0 %vm113_vm1, %v1267_v9 }
  0x13   :  { %1232 = vmatpush3.bf16.msra.mxu0 %v1444_v3 }
  0x14   :  { %1233 = vmatprep.subr.bf16.mxu0 %v1402_v1 }
  0x17   :  { %1234 = vmatpush3.bf16.msra.mxu0 %v1453_v5 }
  0x18   :  { %1247 = vmatprep.subr.bf16.mxu0 %v1402_v1 }
  0xdd   :  { %v307_v10 = vpop.f32.mrb[0].mxu1 }
  0xde   :  { %v1197_v11 = vpop.f32.mrb[1].mxu1 }
  0xdf   :  { %v310_v12 = vpop.f32.mrb[2].mxu1 }
  0xe0   :  { %v1198_v13 = vpop.f32.mrb[3].mxu1 }
  0xe5   :  { %v1177_v15 = vpop.f32.mrb[0].mxu0 }
  0xe6   :  { %v172_v16 = vpop.f32.mrb[1].mxu0  ;;  %v181_v51 = vadd.f32 %v1177_v15, %v1483_v14 }
  0xe7   :  { %v173_v17 = vadd.f32 %v1483_v14, %v172_v16  ;;  %v1178_v18 = vpop.f32.mrb[2].mxu0 }
  0xe8   :  { %v175_v19 = vpop.f32.mrb[3].mxu0  ;;  %v184_v53 = vadd.f32 %v1178_v18, %v1483_v14 }
  0xe9   :  { %v314_v20 = vadd.f32 %v307_v10, %v173_v17  ;;  %v176_v21 = vadd.f32 %v1483_v14, %v175_v19  ;;  %v1268_v19 = vld [vmem:[%s1655_s0 + $0x10] sm:$0xff]  }
  0xea   :  { %1179 = vmatprep.mubr.msk.bf16.mxu0 %vm113_vm1, %v1268_v19 }
  0xeb   :  { %1274 = vtanh.f32 %v314_v20  ;;  %v315_v22 = vadd.f32 %v310_v12, %v176_v21  ;;  %v1108_v25 = vmul.f32 -1.442695, %v314_v20  ;;  %v1269_v20 = vld [vmem:[%s1655_s0 + $0x18] sm:$0xff]  }
  0xec   :  { %1180 = vmatmul.mubr.msk.bf16.gmra.mrb[4].mxu0 %vm113_vm1, %v1269_v20 }
  0xed   :  { %1276 = vtanh.f32 %v315_v22  ;;  %v1109_v26 = vmul.f32 -1.442695, %v315_v22 }
  0xee   :  { %1278 = vpow2.f32 %v1108_v25 }
  0xef   :  { %1280 = vpow2.f32 %v1109_v26 }
  0xf5   :  { %v1275_v23 = vpop.eup %1274 }
  0xf6   :  { %334 = vrot.lane.b32.xlu0 %v1275_v23, %s1405_s5 }
  0xf7   :  { %v1277_v24 = vpop.eup %1276 }
  0xf8   :  { %v1279_v27 = vpop.eup %1278 }
  0xf9   :  { %v322_v28 = vadd.f32 1.0, %v1279_v27  ;;  %v1281_v29 = vpop.eup %1280 }
  0xfa   :  { %336 = vrot.lane.b32.xlu0 %v1277_v24, %s1405_s5  ;;  %v323_v30 = vadd.f32 1.0, %v1281_v29 }
  0xfb   :  { %1282 = vrcp.f32 %v322_v28 }
  0xfc   :  { %1284 = vrcp.f32 %v323_v30 }
 0x105   :  { %v1283_v31 = vpop.eup %1282 }
 0x106   :  { %v1285_v34 = vpop.eup %1284  ;;  %v330_v37 = vmul.f32 0.0, %v1283_v31 }
 0x107   :  { %v331_v40 = vmul.f32 0.0, %v1285_v34 }
 0x168   :  { %v335_v32 = vpop.permute.xlu0 %334 }
 0x169   :  { %v340_v33 = vmul.f32 %v1283_v31, %v335_v32 }
 0x16b   :  { %344 = vrot.lane.b32.xlu1 %v340_v33, %s1406_s3 }
 0x16c   :  { %v337_v35 = vpop.permute.xlu0 %336 }
 0x16d   :  { %v341_v36 = vmul.f32 %v1285_v34, %v337_v35 }
 0x16f   :  { %346 = vrot.lane.b32.xlu1 %v341_v36, %s1406_s3 }
 0x1bf   :  { %v1521_v28 = vpop.f32.mrb[4].mxu0 }
 0x1c0   :  { %v188_v29 = vpop.f32.mrb[5].mxu0 }
 0x1c1   :  { %v1523_v30 = vpop.f32.mrb[6].mxu0  ;;  %v189_v33 = vadd.f32 %v1483_v14, %v188_v29 }
 0x1dd   :  { %v345_v38 = vpop.permute.xlu1 %344 }
 0x1de   :  { %v350_v39 = vadd.f32 %v345_v38, %v330_v37 }
 0x1e0   :  { %1286 = vtanh.f32 %v350_v39 }
 0x1e1   :  { %v347_v41 = vpop.permute.xlu1 %346 }
 0x1e2   :  { %v351_v42 = vadd.f32 %v347_v41, %v331_v40 }
 0x1e4   :  { %1288 = vtanh.f32 %v351_v42 }
 0x1ea   :  { %v1287_v43 = vpop.eup %1286 }
 0x1eb   :  { %356 = vrot.lane.b32.xlu0 %v1287_v43, %s1405_s5 }
 0x1ee   :  { %v1289_v44 = vpop.eup %1288 }
 0x1ef   :  { %358 = vrot.lane.b32.xlu1 %v1289_v44, %s1405_s5 }
 0x25d   :  { %v357_v45 = vpop.permute.xlu0 %356 }
 0x25e   :  { %v362_v47 = vmul.f32 %v1283_v31, %v357_v45  ;;  %v191_v31 = vpop.f32.mrb[7].mxu0 }
 0x25f   :  { %v192_v35 = vadd.f32 %v1483_v14, %v191_v31 }
 0x261   :  { %v359_v46 = vpop.permute.xlu1 %358 }
 0x262   :  { %v363_v48 = vmul.f32 %v1285_v34, %v359_v46 }
 0x264   :  { %v367_v49 = vpack.c.bf16 %v363_v48, %v362_v47 }
 0x266   :  { %369 = vrot.lane.b32.xlu0 %v367_v49, %s1406_s3 }
 0x2d8   :  { %v370_v50 = vpop.permute.xlu0 %369 }
 0x2d9   :  { %1204 = vmatmul.mubr.msk.bf16.vlgmr.msra.gmra.mrb[4].mxu1 %vm269_vm2, %v370_v50 }
 0x2da   :  { %1208 = vmatpush3.bf16.msra.mxu1 %v1444_v3  ;;  %1211 = vmatprep.mubr.msk.bf16.mxu1 %vm1403_vm0, %v1402_v1 }
 0x2db   :  { %1209 = vmatprep.subr.bf16.mxu1 %v1402_v1 }
 0x2de   :  { %1210 = vmatpush3.bf16.msra.mxu1 %v1453_v5 }
 0x2df   :  { %1215 = vmatprep.subr.bf16.mxu1 %v1402_v1 }
 0x3ac   :  { %v408_v52 = vpop.f32.mrb[4].mxu1 }
 0x3ad   :  { %v415_v54 = vadd.f32 %v408_v52, %v181_v51  ;;  %v1205_v55 = vpop.f32.mrb[5].mxu1 }
 0x3ae   :  { %v411_v56 = vpop.f32.mrb[6].mxu1 }
 0x3af   :  { %1290 = vtanh.f32 %v415_v54  ;;  %v416_v57 = vadd.f32 %v411_v56, %v184_v53  ;;  %v1206_v58 = vpop.f32.mrb[7].mxu1  ;;  %v1111_v61 = vmul.f32 -1.442695, %v415_v54 }
 0x3b1   :  { %1292 = vtanh.f32 %v416_v57  ;;  %v1112_v62 = vmul.f32 -1.442695, %v416_v57 }
 0x3b2   :  { %1294 = vpow2.f32 %v1111_v61 }
 0x3b3   :  { %1296 = vpow2.f32 %v1112_v62 }
 0x3b9   :  { %v1291_v59 = vpop.eup %1290 }
 0x3ba   :  { %435 = vrot.lane.b32.xlu1 %v1291_v59, %s1405_s5 }
 0x3bb   :  { %v1293_v60 = vpop.eup %1292 }
 0x3bc   :  { %437 = vrot.lane.b32.xlu0 %v1293_v60, %s1405_s5  ;;  %v1295_v63 = vpop.eup %1294 }
 0x3bd   :  { %v1297_v0 = vpop.eup %1296  ;;  %v423_v2 = vadd.f32 1.0, %v1295_v63 }
 0x3be   :  { %v424_v4 = vadd.f32 1.0, %v1297_v0 }
 0x3bf   :  { %1298 = vrcp.f32 %v423_v2 }
 0x3c0   :  { %1300 = vrcp.f32 %v424_v4 }
 0x3c9   :  { %v1299_v6 = vpop.eup %1298 }
 0x3ca   :  { %v1301_v9 = vpop.eup %1300  ;;  %v431_v12 = vmul.f32 %v1299_v6, %v350_v39 }
 0x3cb   :  { %v432_v16 = vmul.f32 %v1301_v9, %v351_v42 }
 0x42c   :  { %v436_v7 = vpop.permute.xlu1 %435 }
 0x42d   :  { %v441_v8 = vmul.f32 %v1299_v6, %v436_v7 }
 0x42e   :  { %v438_v10 = vpop.permute.xlu0 %437 }
 0x42f   :  { %445 = vrot.lane.b32.xlu1 %v441_v8, %s1406_s3  ;;  %v442_v11 = vmul.f32 %v1301_v9, %v438_v10  ;;  %v197_v8 = vadd.f32 %v1521_v28, %v1483_v14  ;;  %v200_v10 = vadd.f32 %v1523_v30, %v1483_v14 }
 0x431   :  { %447 = vrot.lane.b32.xlu0 %v442_v11, %s1406_s3 }
 0x4a1   :  { %v446_v13 = vpop.permute.xlu1 %445 }
 0x4a2   :  { %v1507_v15 = vadd.f32 %v446_v13, %v431_v12 }
 0x4a3   :  { %v448_v17 = vpop.permute.xlu0 %447 }
 0x4a4   :  { %1302 = vtanh.f32 %v1507_v15  ;;  %v452_v18 = vadd.f32 %v448_v17, %v432_v16 }
 0x4a6   :  { %1304 = vtanh.f32 %v452_v18 }
 0x4ae   :  { %v1303_v21 = vpop.eup %1302 }
 0x4af   :  { %457 = vrot.lane.b32.xlu1 %v1303_v21, %s1405_s5 }
 0x4b0   :  { %v1305_v22 = vpop.eup %1304 }
 0x4b1   :  { %459 = vrot.lane.b32.xlu0 %v1305_v22, %s1405_s5 }
 0x521   :  { %v458_v23 = vpop.permute.xlu1 %457 }
 0x522   :  { %v463_v25 = vmul.f32 %v1299_v6, %v458_v23 }
 0x523   :  { %v460_v24 = vpop.permute.xlu0 %459 }
 0x524   :  { %v464_v26 = vmul.f32 %v1301_v9, %v460_v24 }
 0x526   :  { %v468_v27 = vpack.c.bf16 %v464_v26, %v463_v25 }
 0x528   :  { %470 = vrot.lane.b32.xlu1 %v468_v27, %s1406_s3 }
 0x59a   :  { %v471_v32 = vpop.permute.xlu1 %470 }
 0x59b   :  { %1212 = vmatmul.mubr.msk.bf16.vlgmr.msra.gmra.mrb[8].mxu1 %vm269_vm2, %v471_v32 }
 0x59c   :  { %1216 = vmatpush3.bf16.msra.mxu1 %v1444_v3  ;;  %1219 = vmatprep.mubr.msk.bf16.mxu1 %vm1403_vm0, %v1402_v1 }
 0x59d   :  { %1217 = vmatprep.subr.bf16.mxu1 %v1402_v1 }
 0x5a0   :  { %1218 = vmatpush3.bf16.msra.mxu1 %v1453_v5 }
 0x5a1   :  { %1223 = vmatprep.subr.bf16.mxu1 %v1402_v1 }
 0x66e   :  { %v509_v34 = vpop.f32.mrb[8].mxu1 }
 0x66f   :  { %v516_v36 = vadd.f32 %v509_v34, %v189_v33  ;;  %v1213_v37 = vpop.f32.mrb[9].mxu1 }
 0x670   :  { %v512_v38 = vpop.f32.mrb[10].mxu1  ;;  %v1270_v37 = vld [vmem:[%s1655_s0 + $0x20] sm:$0xff]  }
 0x671   :  { %1306 = vtanh.f32 %v516_v36  ;;  %v517_v39 = vadd.f32 %v512_v38, %v192_v35  ;;  %v1214_v40 = vpop.f32.mrb[11].mxu1  ;;  %v1114_v43 = vmul.f32 -1.442695, %v516_v36  ;;  %v1271_v38 = vld [vmem:[%s1655_s0 + $0x28] sm:$0xff]   ;;  %1183 = vmatprep.mubr.msk.bf16.mxu0 %vm113_vm1, %v1270_v37 }
 0x672   :  { %1184 = vmatmul.mubr.msk.bf16.gmra.mrb[8].mxu0 %vm113_vm1, %v1271_v38 }
 0x673   :  { %1308 = vtanh.f32 %v517_v39  ;;  %v1115_v44 = vmul.f32 -1.442695, %v517_v39 }
 0x674   :  { %1310 = vpow2.f32 %v1114_v43 }
 0x675   :  { %1312 = vpow2.f32 %v1115_v44 }
 0x67b   :  { %v1307_v41 = vpop.eup %1306 }
 0x67c   :  { %536 = vrot.lane.b32.xlu0 %v1307_v41, %s1405_s5 }
 0x67d   :  { %v1309_v42 = vpop.eup %1308 }
 0x67e   :  { %538 = vrot.lane.b32.xlu1 %v1309_v42, %s1405_s5  ;;  %v1311_v45 = vpop.eup %1310 }
 0x67f   :  { %v1313_v46 = vpop.eup %1312  ;;  %v524_v47 = vadd.f32 1.0, %v1311_v45 }
 0x680   :  { %v525_v48 = vadd.f32 1.0, %v1313_v46 }
 0x681   :  { %1314 = vrcp.f32 %v524_v47 }
 0x682   :  { %1316 = vrcp.f32 %v525_v48 }
 0x68b   :  { %v1315_v49 = vpop.eup %1314 }
 0x68c   :  { %v1317_v52 = vpop.eup %1316  ;;  %v532_v55 = vmul.f32 %v1315_v49, %v1507_v15 }
 0x68d   :  { %v533_v58 = vmul.f32 %v1317_v52, %v452_v18 }
 0x6ee   :  { %v537_v50 = vpop.permute.xlu0 %536 }
 0x6ef   :  { %v542_v51 = vmul.f32 %v1315_v49, %v537_v50 }
 0x6f0   :  { %v539_v53 = vpop.permute.xlu1 %538 }
 0x6f1   :  { %546 = vrot.lane.b32.xlu0 %v542_v51, %s1406_s3  ;;  %v543_v54 = vmul.f32 %v1317_v52, %v539_v53 }
 0x6f3   :  { %548 = vrot.lane.b32.xlu1 %v543_v54, %s1406_s3 }
 0x745   :  { %v1568_v46 = vpop.f32.mrb[8].mxu0 }
 0x746   :  { %v204_v47 = vpop.f32.mrb[9].mxu0 }
 0x747   :  { %v1570_v48 = vpop.f32.mrb[10].mxu0  ;;  %v205_v51 = vadd.f32 %v1483_v14, %v204_v47 }
 0x763   :  { %v547_v56 = vpop.permute.xlu0 %546 }
 0x764   :  { %v552_v57 = vadd.f32 %v547_v56, %v532_v55 }
 0x765   :  { %v549_v59 = vpop.permute.xlu1 %548 }
 0x766   :  { %1318 = vtanh.f32 %v552_v57  ;;  %v553_v60 = vadd.f32 %v549_v59, %v533_v58 }
 0x768   :  { %1320 = vtanh.f32 %v553_v60 }
 0x770   :  { %v1319_v61 = vpop.eup %1318 }
 0x771   :  { %558 = vrot.lane.b32.xlu0 %v1319_v61, %s1405_s5 }
 0x772   :  { %v1321_v62 = vpop.eup %1320 }
 0x773   :  { %560 = vrot.lane.b32.xlu1 %v1321_v62, %s1405_s5 }
 0x7e3   :  { %v559_v63 = vpop.permute.xlu0 %558 }
 0x7e4   :  { %v564_v2 = vmul.f32 %v1315_v49, %v559_v63  ;;  %v207_v49 = vpop.f32.mrb[11].mxu0 }
 0x7e5   :  { %v561_v0 = vpop.permute.xlu1 %560  ;;  %v208_v53 = vadd.f32 %v1483_v14, %v207_v49 }
 0x7e6   :  { %v565_v4 = vmul.f32 %v1317_v52, %v561_v0 }
 0x7e8   :  { %v569_v6 = vpack.c.bf16 %v565_v4, %v564_v2 }
 0x7ea   :  { %571 = vrot.lane.b32.xlu0 %v569_v6, %s1406_s3 }
 0x85c   :  { %v572_v7 = vpop.permute.xlu0 %571 }
 0x85d   :  { %1220 = vmatmul.mubr.msk.bf16.vlgmr.msra.gmra.mrb[12].mxu1 %vm269_vm2, %v572_v7 }
 0x85e   :  { %1224 = vmatpush3.bf16.msra.mxu1 %v1444_v3  ;;  %1227 = vmatprep.mubr.msk.bf16.mxu1 %vm1403_vm0, %v1402_v1 }
 0x85f   :  { %1225 = vmatprep.subr.bf16.mxu1 %v1402_v1 }
 0x862   :  { %1226 = vmatpush3.bf16.msra.mxu1 %v1453_v5 }
 0x863   :  { %1239 = vmatprep.subr.bf16.mxu1 %v1402_v1 }
 0x930   :  { %v610_v9 = vpop.f32.mrb[12].mxu1 }
 0x931   :  { %v617_v11 = vadd.f32 %v610_v9, %v197_v8  ;;  %v1221_v12 = vpop.f32.mrb[13].mxu1 }
 0x932   :  { %v613_v13 = vpop.f32.mrb[14].mxu1 }
 0x933   :  { %1322 = vtanh.f32 %v617_v11  ;;  %v618_v15 = vadd.f32 %v613_v13, %v200_v10  ;;  %v1222_v16 = vpop.f32.mrb[15].mxu1  ;;  %v1117_v19 = vmul.f32 -1.442695, %v617_v11 }
 0x935   :  { %1324 = vtanh.f32 %v618_v15  ;;  %v1118_v20 = vmul.f32 -1.442695, %v618_v15 }
 0x936   :  { %1326 = vpow2.f32 %v1117_v19  ;;  %v1272_v19 = vld [vmem:[%s1655_s0 + $0x30] sm:$0xff]  }
 0x937   :  { %1328 = vpow2.f32 %v1118_v20  ;;  %v1273_v20 = vld [vmem:[%s1655_s0 + $0x38] sm:$0xff]   ;;  %1187 = vmatprep.mubr.msk.bf16.mxu0 %vm113_vm1, %v1272_v19 }
 0x938   :  { %1188 = vmatmul.mubr.msk.bf16.gmra.mrb[12].mxu0 %vm113_vm1, %v1273_v20 }
 0x939   :  { %1235 = vmatprep.mubr.msk.bf16.mxu0 %vm1403_vm0, %v1402_v1 }
 0x93d   :  { %v1323_v17 = vpop.eup %1322 }
 0x93e   :  { %637 = vrot.lane.b32.xlu1 %v1323_v17, %s1405_s5 }
 0x93f   :  { %v1325_v18 = vpop.eup %1324 }
 0x940   :  { %639 = vrot.lane.b32.xlu0 %v1325_v18, %s1405_s5  ;;  %v1327_v21 = vpop.eup %1326 }
 0x941   :  { %v1329_v22 = vpop.eup %1328  ;;  %v625_v23 = vadd.f32 1.0, %v1327_v21 }
 0x942   :  { %v626_v24 = vadd.f32 1.0, %v1329_v22 }
 0x943   :  { %1330 = vrcp.f32 %v625_v23 }
 0x944   :  { %1332 = vrcp.f32 %v626_v24 }
 0x94d   :  { %v1331_v25 = vpop.eup %1330 }
 0x94e   :  { %v1333_v28 = vpop.eup %1332  ;;  %v633_v31 = vmul.f32 %v1331_v25, %v552_v57 }
 0x94f   :  { %v634_v34 = vmul.f32 %v1333_v28, %v553_v60 }
 0x9b0   :  { %v638_v26 = vpop.permute.xlu1 %637 }
 0x9b1   :  { %v643_v27 = vmul.f32 %v1331_v25, %v638_v26 }
 0x9b2   :  { %v640_v29 = vpop.permute.xlu0 %639 }
 0x9b3   :  { %647 = vrot.lane.b32.xlu1 %v643_v27, %s1406_s3  ;;  %v644_v30 = vmul.f32 %v1333_v28, %v640_v29 }
 0x9b5   :  { %649 = vrot.lane.b32.xlu0 %v644_v30, %s1406_s3 }
 0xa25   :  { %v648_v32 = vpop.permute.xlu1 %647 }
 0xa26   :  { %v653_v33 = vadd.f32 %v648_v32, %v633_v31 }
 0xa27   :  { %v650_v35 = vpop.permute.xlu0 %649 }
 0xa28   :  { %1334 = vtanh.f32 %v653_v33  ;;  %v654_v36 = vadd.f32 %v650_v35, %v634_v34  ;;  %v216_v35 = vadd.f32 %v1570_v48, %v1483_v14 }
 0xa2a   :  { %1336 = vtanh.f32 %v654_v36 }
 0xa32   :  { %v1335_v39 = vpop.eup %1334 }
 0xa33   :  { %659 = vrot.lane.b32.xlu1 %v1335_v39, %s1405_s5 }
 0xa34   :  { %v1337_v40 = vpop.eup %1336 }
 0xa35   :  { %661 = vrot.lane.b32.xlu0 %v1337_v40, %s1405_s5 }
 0xaa5   :  { %v660_v41 = vpop.permute.xlu1 %659 }
 0xaa6   :  { %v665_v43 = vmul.f32 %v1331_v25, %v660_v41 }
 0xaa7   :  { %v662_v42 = vpop.permute.xlu0 %661 }
 0xaa8   :  { %v666_v44 = vmul.f32 %v1333_v28, %v662_v42  ;;  %v1600_v28 = vpop.f32.mrb[12].mxu0 }
 0xaa9   :  { %v220_v29 = vpop.f32.mrb[13].mxu0 }
 0xaaa   :  { %v670_v45 = vpack.c.bf16 %v666_v44, %v665_v43  ;;  %v1602_v30 = vpop.f32.mrb[14].mxu0 }
 0xaab   :  { %v223_v31 = vpop.f32.mrb[15].mxu0 }
 0xaac   :  { %672 = vrot.lane.b32.xlu1 %v670_v45, %s1406_s3 }
 0xb1e   :  { %v673_v50 = vpop.permute.xlu1 %672 }
 0xb1f   :  { %1228 = vmatmul.mubr.msk.bf16.vlgmr.msra.gmra.mrb[16].mxu1 %vm269_vm2, %v673_v50 }
 0xb20   :  { %1240 = vmatpush3.bf16.msra.mxu1 %v1444_v3  ;;  %1243 = vmatprep.mubr.msk.bf16.mxu1 %vm1403_vm0, %v1402_v1 }
 0xb21   :  { %1241 = vmatprep.subr.bf16.mxu1 %v1402_v1 }
 0xb24   :  { %1242 = vmatpush3.bf16.msra.mxu1 %v1453_v5 }
 0xbf2   :  { %v711_v52 = vpop.f32.mrb[16].mxu1 }
 0xbf3   :  { %v718_v54 = vadd.f32 %v711_v52, %v205_v51  ;;  %v1229_v55 = vpop.f32.mrb[17].mxu1 }
 0xbf4   :  { %v714_v56 = vpop.f32.mrb[18].mxu1 }
 0xbf5   :  { %1338 = vtanh.f32 %v718_v54  ;;  %v719_v57 = vadd.f32 %v714_v56, %v208_v53  ;;  %v1230_v58 = vpop.f32.mrb[19].mxu1  ;;  %v1120_v61 = vmul.f32 -1.442695, %v718_v54 }
 0xbf7   :  { %1340 = vtanh.f32 %v719_v57  ;;  %v1121_v62 = vmul.f32 -1.442695, %v719_v57 }
 0xbf8   :  { %1342 = vpow2.f32 %v1120_v61 }
 0xbf9   :  { %1344 = vpow2.f32 %v1121_v62 }
 0xbff   :  { %v1339_v59 = vpop.eup %1338 }
 0xc00   :  { %738 = vrot.lane.b32.xlu0 %v1339_v59, %s1405_s5 }
 0xc01   :  { %v1341_v60 = vpop.eup %1340 }
 0xc02   :  { %740 = vrot.lane.b32.xlu1 %v1341_v60, %s1405_s5  ;;  %v1343_v63 = vpop.eup %1342 }
 0xc03   :  { %v1345_v0 = vpop.eup %1344  ;;  %v726_v2 = vadd.f32 1.0, %v1343_v63 }
 0xc04   :  { %v727_v4 = vadd.f32 1.0, %v1345_v0 }
 0xc05   :  { %1346 = vrcp.f32 %v726_v2 }
 0xc06   :  { %1348 = vrcp.f32 %v727_v4  ;;  %v221_v4 = vadd.f32 %v1483_v14, %v220_v29 }
 0xc0f   :  { %v1347_v6 = vpop.eup %1346 }
 0xc10   :  { %v1349_v9 = vpop.eup %1348  ;;  %v734_v12 = vmul.f32 %v1347_v6, %v653_v33  ;;  %v213_v33 = vadd.f32 %v1568_v46, %v1483_v14 }
 0xc11   :  { %v735_v16 = vmul.f32 %v1349_v9, %v654_v36 }
 0xc72   :  { %v739_v7 = vpop.permute.xlu0 %738 }
 0xc73   :  { %v744_v8 = vmul.f32 %v1347_v6, %v739_v7  ;;  %v224_v7 = vadd.f32 %v1483_v14, %v223_v31 }
 0xc74   :  { %v741_v10 = vpop.permute.xlu1 %740 }
 0xc75   :  { %748 = vrot.lane.b32.xlu0 %v744_v8, %s1406_s3  ;;  %v745_v11 = vmul.f32 %v1349_v9, %v741_v10 }
 0xc77   :  { %750 = vrot.lane.b32.xlu1 %v745_v11, %s1406_s3 }
 0xce7   :  { %v749_v13 = vpop.permute.xlu0 %748 }
 0xce8   :  { %v1584_v15 = vadd.f32 %v749_v13, %v734_v12 }
 0xce9   :  { %v751_v17 = vpop.permute.xlu1 %750 }
 0xcea   :  { %1350 = vtanh.f32 %v1584_v15  ;;  %v755_v18 = vadd.f32 %v751_v17, %v735_v16 }
 0xcec   :  { %1352 = vtanh.f32 %v755_v18 }
 0xcf4   :  { %v1351_v21 = vpop.eup %1350 }
 0xcf5   :  { %760 = vrot.lane.b32.xlu0 %v1351_v21, %s1405_s5 }
 0xcf6   :  { %v1353_v22 = vpop.eup %1352 }
 0xcf7   :  { %762 = vrot.lane.b32.xlu1 %v1353_v22, %s1405_s5 }
 0xd67   :  { %v761_v23 = vpop.permute.xlu0 %760 }
 0xd68   :  { %v766_v25 = vmul.f32 %v1347_v6, %v761_v23 }
 0xd69   :  { %v763_v24 = vpop.permute.xlu1 %762 }
 0xd6a   :  { %v767_v26 = vmul.f32 %v1349_v9, %v763_v24 }
 0xd6c   :  { %v771_v27 = vpack.c.bf16 %v767_v26, %v766_v25 }
 0xd6e   :  { %773 = vrot.lane.b32.xlu0 %v771_v27, %s1406_s3 }
 0xde0   :  { %v774_v32 = vpop.permute.xlu0 %773 }
 0xde1   :  { %1236 = vmatmul.mubr.msk.bf16.vlgmr.msra.gmra.mrb[16].mxu0 %vm269_vm2, %v774_v32 }
 0xde2   :  { %1248 = vmatpush3.bf16.msra.mxu0 %v1444_v3  ;;  %1251 = vmatprep.mubr.msk.bf16.mxu0 %vm1403_vm0, %v1402_v1 }
 0xde3   :  { %1249 = vmatprep.subr.bf16.mxu0 %v1402_v1 }
 0xde6   :  { %1250 = vmatpush3.bf16.msra.mxu0 %v1453_v5 }
 0xeb4   :  { %v812_v34 = vpop.f32.mrb[16].mxu0 }
 0xeb5   :  { %v819_v36 = vadd.f32 %v812_v34, %v213_v33  ;;  %v1237_v37 = vpop.f32.mrb[17].mxu0 }
 0xeb6   :  { %v815_v38 = vpop.f32.mrb[18].mxu0 }
 0xeb7   :  { %1354 = vtanh.f32 %v819_v36  ;;  %v820_v39 = vadd.f32 %v815_v38, %v216_v35  ;;  %v1238_v3 = vpop.f32.mrb[19].mxu0  ;;  %v1123_v5 = vmul.f32 -1.442695, %v819_v36 }
 0xeb9   :  { %1356 = vtanh.f32 %v820_v39  ;;  %v1124_v41 = vmul.f32 -1.442695, %v820_v39 }
 0xeba   :  { %1358 = vpow2.f32 %v1123_v5 }
 0xebb   :  { %1360 = vpow2.f32 %v1124_v41  ;;  %v229_v41 = vadd.f32 %v1600_v28, %v1483_v14 }
 0xec1   :  { %v1355_v40 = vpop.eup %1354 }
 0xec2   :  { %839 = vrot.lane.b32.xlu1 %v1355_v40, %s1405_s5 }
 0xec3   :  { %v1357_v1 = vpop.eup %1356 }
 0xec4   :  { %841 = vrot.lane.b32.xlu0 %v1357_v1, %s1405_s5  ;;  %v1359_v42 = vpop.eup %1358 }
 0xec5   :  { %v1361_v43 = vpop.eup %1360  ;;  %v827_v44 = vadd.f32 1.0, %v1359_v42 }
 0xec6   :  { %v828_v45 = vadd.f32 1.0, %v1361_v43  ;;  %v232_v43 = vadd.f32 %v1602_v30, %v1483_v14 }
 0xec7   :  { %1362 = vrcp.f32 %v827_v44 }
 0xec8   :  { %1364 = vrcp.f32 %v828_v45 }
 0xed1   :  { %v1363_v46 = vpop.eup %1362 }
 0xed2   :  { %v1365_v49 = vpop.eup %1364  ;;  %v835_v52 = vmul.f32 %v1363_v46, %v1584_v15 }
 0xed3   :  { %v836_v55 = vmul.f32 %v1365_v49, %v755_v18 }
 0xf34   :  { %v840_v47 = vpop.permute.xlu1 %839 }
 0xf35   :  { %v845_v48 = vmul.f32 %v1363_v46, %v840_v47 }
 0xf36   :  { %v842_v50 = vpop.permute.xlu0 %841 }
 0xf37   :  { %849 = vrot.lane.b32.xlu1 %v845_v48, %s1406_s3  ;;  %v846_v51 = vmul.f32 %v1365_v49, %v842_v50 }
 0xf39   :  { %851 = vrot.lane.b32.xlu0 %v846_v51, %s1406_s3 }
 0xfa9   :  { %v850_v53 = vpop.permute.xlu1 %849 }
 0xfaa   :  { %v855_v54 = vadd.f32 %v850_v53, %v835_v52 }
 0xfab   :  { %v852_v56 = vpop.permute.xlu0 %851 }
 0xfac   :  { %1366 = vtanh.f32 %v855_v54  ;;  %v856_v57 = vadd.f32 %v852_v56, %v836_v55 }
 0xfae   :  { %1368 = vtanh.f32 %v856_v57 }
 0xfb6   :  { %v1367_v58 = vpop.eup %1366 }
 0xfb7   :  { %861 = vrot.lane.b32.xlu1 %v1367_v58, %s1405_s5 }
 0xfb8   :  { %v1369_v59 = vpop.eup %1368 }
 0xfb9   :  { %863 = vrot.lane.b32.xlu0 %v1369_v59, %s1405_s5 }
0x1029   :  { %v862_v60 = vpop.permute.xlu1 %861 }
0x102a   :  { %v867_v62 = vmul.f32 %v1363_v46, %v862_v60 }
0x102b   :  { %v864_v61 = vpop.permute.xlu0 %863 }
0x102c   :  { %v868_v63 = vmul.f32 %v1365_v49, %v864_v61 }
0x102e   :  { %v872_v0 = vpack.c.bf16 %v868_v63, %v867_v62 }
0x1030   :  { %874 = vrot.lane.b32.xlu1 %v872_v0, %s1406_s3 }
0x10a2   :  { %v875_v2 = vpop.permute.xlu1 %874 }
0x10a3   :  { %1244 = vmatmul.mubr.msk.bf16.vlgmr.msra.gmra.mrb[20].mxu1 %vm269_vm2, %v875_v2 }
0x1176   :  { %v913_v6 = vpop.f32.mrb[20].mxu1 }
0x1177   :  { %v920_v8 = vadd.f32 %v913_v6, %v221_v4  ;;  %v1245_v9 = vpop.f32.mrb[21].mxu1 }
0x1178   :  { %v916_v10 = vpop.f32.mrb[22].mxu1 }
0x1179   :  { %1370 = vtanh.f32 %v920_v8  ;;  %v921_v11 = vadd.f32 %v916_v10, %v224_v7  ;;  %v1246_v12 = vpop.f32.mrb[23].mxu1  ;;  %v1126_v16 = vmul.f32 -1.442695, %v920_v8 }
0x117b   :  { %1372 = vtanh.f32 %v921_v11  ;;  %v1127_v17 = vmul.f32 -1.442695, %v921_v11 }
0x117c   :  { %1374 = vpow2.f32 %v1126_v16 }
0x117d   :  { %1376 = vpow2.f32 %v1127_v17 }
0x1183   :  { %v1371_v13 = vpop.eup %1370 }
0x1184   :  { %940 = vrot.lane.b32.xlu0 %v1371_v13, %s1405_s5 }
0x1185   :  { %v1373_v15 = vpop.eup %1372 }
0x1186   :  { %942 = vrot.lane.b32.xlu1 %v1373_v15, %s1405_s5  ;;  %v1375_v18 = vpop.eup %1374 }
0x1187   :  { %v1377_v19 = vpop.eup %1376  ;;  %v928_v20 = vadd.f32 1.0, %v1375_v18 }
0x1188   :  { %v929_v21 = vadd.f32 1.0, %v1377_v19 }
0x1189   :  { %1378 = vrcp.f32 %v928_v20 }
0x118a   :  { %1380 = vrcp.f32 %v929_v21 }
0x1193   :  { %v1379_v22 = vpop.eup %1378 }
0x1194   :  { %v1381_v25 = vpop.eup %1380  ;;  %v936_v29 = vmul.f32 %v1379_v22, %v855_v54 }
0x1195   :  { %v937_v33 = vmul.f32 %v1381_v25, %v856_v57 }
0x11f6   :  { %v941_v23 = vpop.permute.xlu0 %940 }
0x11f7   :  { %v946_v24 = vmul.f32 %v1379_v22, %v941_v23 }
0x11f8   :  { %v943_v26 = vpop.permute.xlu1 %942 }
0x11f9   :  { %950 = vrot.lane.b32.xlu0 %v946_v24, %s1406_s3  ;;  %v947_v27 = vmul.f32 %v1381_v25, %v943_v26 }
0x11fb   :  { %952 = vrot.lane.b32.xlu1 %v947_v27, %s1406_s3 }
0x126b   :  { %v951_v31 = vpop.permute.xlu0 %950 }
0x126c   :  { %v956_v32 = vadd.f32 %v951_v31, %v936_v29 }
0x126d   :  { %v953_v34 = vpop.permute.xlu1 %952 }
0x126e   :  { %1382 = vtanh.f32 %v956_v32  ;;  %v957_v35 = vadd.f32 %v953_v34, %v937_v33 }
0x1270   :  { %1384 = vtanh.f32 %v957_v35 }
0x1278   :  { %v1383_v36 = vpop.eup %1382 }
0x1279   :  { %962 = vrot.lane.b32.xlu0 %v1383_v36, %s1405_s5 }
0x127a   :  { %v1385_v37 = vpop.eup %1384 }
0x127b   :  { %964 = vrot.lane.b32.xlu1 %v1385_v37, %s1405_s5 }
0x12eb   :  { %v963_v38 = vpop.permute.xlu0 %962 }
0x12ec   :  { %v968_v3 = vmul.f32 %v1379_v22, %v963_v38 }
0x12ed   :  { %v965_v39 = vpop.permute.xlu1 %964 }
0x12ee   :  { %v969_v40 = vmul.f32 %v1381_v25, %v965_v39 }
0x12f0   :  { %v973_v1 = vpack.c.bf16 %v969_v40, %v968_v3 }
0x12f2   :  { %975 = vrot.lane.b32.xlu0 %v973_v1, %s1406_s3 }
0x1364   :  { %v976_v5 = vpop.permute.xlu0 %975 }
0x1365   :  { %1252 = vmatmul.mubr.msk.bf16.vlgmr.msra.gmra.mrb[20].mxu0 %vm269_vm2, %v976_v5 }
0x1438   :  { %v1014_v42 = vpop.f32.mrb[20].mxu0 }
0x1439   :  { %v1021_v44 = vadd.f32 %v1014_v42, %v229_v41  ;;  %v1253_v45 = vpop.f32.mrb[21].mxu0 }
0x143a   :  { %v1017_v46 = vpop.f32.mrb[22].mxu0 }
0x143b   :  { %1386 = vtanh.f32 %v1021_v44  ;;  %v1022_v47 = vadd.f32 %v1017_v46, %v232_v43  ;;  %v1254_v48 = vpop.f32.mrb[23].mxu0  ;;  %v1129_v51 = vmul.f32 -1.442695, %v1021_v44 }
0x143d   :  { %1388 = vtanh.f32 %v1022_v47  ;;  %v1130_v52 = vmul.f32 -1.442695, %v1022_v47 }
0x143e   :  { %1390 = vpow2.f32 %v1129_v51 }
0x143f   :  { %1392 = vpow2.f32 %v1130_v52 }
0x1445   :  { %v1387_v49 = vpop.eup %1386 }
0x1446   :  { %1041 = vrot.lane.b32.xlu1 %v1387_v49, %s1405_s5 }
0x1447   :  { %v1389_v50 = vpop.eup %1388 }
0x1448   :  { %1043 = vrot.lane.b32.xlu0 %v1389_v50, %s1405_s5  ;;  %v1391_v28 = vpop.eup %1390 }
0x1449   :  { %v1393_v53 = vpop.eup %1392  ;;  %v1029_v14 = vadd.f32 1.0, %v1391_v28 }
0x144a   :  { %v1030_v30 = vadd.f32 1.0, %v1393_v53 }
0x144b   :  { %1394 = vrcp.f32 %v1029_v14 }
0x144c   :  { %1396 = vrcp.f32 %v1030_v30 }
0x1455   :  { %v1395_v54 = vpop.eup %1394 }
0x1456   :  { %v1397_v57 = vpop.eup %1396  ;;  %v1037_v60 = vmul.f32 %v1395_v54, %v956_v32 }
0x1457   :  { %v1038_v63 = vmul.f32 %v1397_v57, %v957_v35 }
0x14b8   :  { %v1042_v55 = vpop.permute.xlu1 %1041 }
0x14b9   :  { %v1047_v56 = vmul.f32 %v1395_v54, %v1042_v55 }
0x14ba   :  { %v1044_v58 = vpop.permute.xlu0 %1043 }
0x14bb   :  { %1051 = vrot.lane.b32.xlu1 %v1047_v56, %s1406_s3  ;;  %v1048_v59 = vmul.f32 %v1397_v57, %v1044_v58 }
0x14bd   :  { %1053 = vrot.lane.b32.xlu0 %v1048_v59, %s1406_s3 }
0x152d   :  { %v1052_v61 = vpop.permute.xlu1 %1051 }
0x152e   :  { %v1057_v62 = vadd.f32 %v1052_v61, %v1037_v60 }
0x152f   :  { %v1054_v0 = vpop.permute.xlu0 %1053 }
0x1530   :  { %1398 = vtanh.f32 %v1057_v62  ;;  %v1058_v2 = vadd.f32 %v1054_v0, %v1038_v63 }
0x1532   :  { %1400 = vtanh.f32 %v1058_v2 }
0x153a   :  { %v1399_v4 = vpop.eup %1398 }
0x153b   :  { %1063 = vrot.lane.b32.xlu1 %v1399_v4, %s1405_s5 }
0x153c   :  { %v1401_v6 = vpop.eup %1400 }
0x153d   :  { %1065 = vrot.lane.b32.xlu0 %v1401_v6, %s1405_s5 }
0x15ad   :  { %v1064_v7 = vpop.permute.xlu1 %1063 }
0x15ae   :  { %v1069_v8 = vmul.f32 %v1395_v54, %v1064_v7 }
0x15af   :  { %v1066_v9 = vpop.permute.xlu0 %1065 }
0x15b0   :  { %1073 = vrot.lane.b32.xlu1 %v1069_v8, %s1406_s3  ;;  %v1070_v10 = vmul.f32 %v1397_v57, %v1066_v9 }
0x15b2   :  { %1075 = vrot.lane.b32.xlu0 %v1070_v10, %s1406_s3 }
0x1622   :  { %v1074_v11 = vpop.permute.xlu1 %1073 }
0x1623   :  { %1079 = vst.msk [vmem:[%s1657_s4] sm:$0xff] %vm269_vm2, %v1074_v11 }
0x1624   :  { %v1076_v12 = vpop.permute.xlu0 %1075 }
0x1625   :  { %1080 = vst.msk [vmem:[%s1657_s4 + $0x8] sm:$0xff] %vm269_vm2, %v1076_v12 }

</bundles_post_ra>
